<compile_context>
chip_gen: v5e
topology: v5e:2x2
jax: 0.10.0
libtpu: 0.0.40
codegen_flags: <defaults>
</compile_context>

<pallas_src>
import numpy as np
import jax
import jax.numpy as jnp
from jax.experimental import pallas as pl
from jax.experimental.pallas import tpu as pltpu


# ----------------------------------------------------------------------------
# Fused kernel: per grid step (n, k) process `th` full-resolution rows of
# image n and accumulate their contribution to the upsampled output plane.
#
#   x_ref   : (1, Cin, th*W)  row chunk, spatial flattened on the lane axis
#   wbT_ref : (Cb, Cin)   body 1x1-conv weight (transposed)
#   bbT_ref : (Cb, 1)     body bias
#   whcT_ref: (T,  Cb)    fused head@cls weight (transposed)
#   bhcT_ref: (T,  1)     fused head@cls bias
#   a3_ref  : (1, Hout, th)  height-interp chunk (row subsample folded in)
#   bwT_ref : (W, Wout)      width-interp (col subsample folded in), transposed
#   o_ref   : (1, T, Hout, Wout)  output plane, accumulated across k
#   lgs_ref : (T, th, W)  VMEM scratch used to re-tile the logits
# ----------------------------------------------------------------------------
def fused_seg_kernel(x_ref, wbT_ref, bbT_ref, whcT_ref, bhcT_ref,
                     a3_ref, bwT_ref, o_ref, lgs_ref):
    k = pl.program_id(1)

    @pl.when(k == 0)
    def _init():
        o_ref[...] = jnp.zeros_like(o_ref)

    t_cls, th, w = lgs_ref.shape

    # ---- channel stage (f32): body 1x1-conv + ReLU, then fused head@cls ----
    x2 = x_ref[0]                                                   # (Cin, th*W)
    h = jnp.dot(wbT_ref[...], x2,
                preferred_element_type=jnp.float32) + bbT_ref[...]  # (Cb, th*W)
    h = jnp.maximum(h, 0.0)                                         # body ReLU
    lg = jnp.dot(whcT_ref[...], h,
                 preferred_element_type=jnp.float32) + bhcT_ref[...]  # (T, th*W)

    # ---- bridge: re-tile (T, th*W) -> (T, th, W) through a small VMEM scratch
    # (only static unit-stride slices + ref stores; avoids a lane-splitting
    # reshape).  The logits chunk is the smallest tensor in the pipeline.
    for r in range(th):
        lgs_ref[:, r, :] = lg[:, r * w:(r + 1) * w]

    lgr = lgs_ref[...].reshape(t_cls * th, w).astype(bwT_ref.dtype)  # (T*th, W)

    # ---- separable bilinear upsample (stride-2 subsample folded into the
    # interp matrices).  Width matmul is one flattened MXU matmul over all
    # classes; the height-interp chunk stays weight-stationary across classes.
    tmp = jnp.dot(lgr, bwT_ref[...],
                  preferred_element_type=jnp.float32)                # (T*th, Wout)
    tmp = tmp.astype(bwT_ref.dtype)
    a_chunk = a3_ref[0]                                              # (Hout, th)
    for t in range(t_cls):
        blk = jnp.dot(a_chunk, tmp[t * th:(t + 1) * th, :],
                      preferred_element_type=jnp.float32)            # (Hout, Wout)
        o_ref[0, t] = o_ref[0, t] + blk


# ----------------------------------------------------------------------------
# PyTorch-exact bilinear interpolation matrix (align_corners=False)
# ----------------------------------------------------------------------------
def bilinear_matrix(out_size, in_size):
    m = np.zeros((out_size, in_size), dtype=np.float32)
    scale = in_size / out_size
    for i in range(out_size):
        src = (i + 0.5) * scale - 0.5
        if src < 0.0:
            src = 0.0
        x0 = min(int(np.floor(src)), in_size - 1)
        x1 = min(x0 + 1, in_size - 1)
        l1 = src - x0
        l0 = 1.0 - l1
        m[i, x0] += l0
        m[i, x1] += l1
    return m


# ----------------------------------------------------------------------------
# Row-chunk chooser: lane-dense chunks (<= target_lanes), no padding (th | H,
# th*W % 128 == 0), >= 4 total grid steps when possible (2 per v7x core),
# VMEM-aware cap on the chunk size.
# ----------------------------------------------------------------------------
def _choose_row_chunks(N, H, W, cin, cb, t_cls, target_lanes=4096,
                       vmem_budget_bytes=24 * 1024 * 1024):
    # f32 bytes per chunk lane that scale with the chunk (x double-buffered,
    # h / logits intermediates, bridge scratch); grid-invariant weights ignored.
    per_lane = 4 * (2 * cin + cb + 2 * t_cls + 1)
    max_lanes = max(128, (vmem_budget_bytes // per_lane) // 128 * 128)
    target = min(target_lanes, max_lanes)

    cands = []
    for kh in range(1, H + 1):
        if H % kh:
            continue
        th = H // kh
        if kh > 1 and (th % 8 != 0 or (th * W) % 128 != 0):
            continue                      # keep blocks (8,128)-legal, no padding
        cands.append((kh, th))
    small = [c for c in cands if c[1] * W <= target] or cands
    pool = [c for c in small if N * c[0] >= 4] or small
    kh, th = min(pool, key=lambda c: c[0])   # largest chunk among what is left
    return kh, th


# ----------------------------------------------------------------------------
# Module wrapper
# ----------------------------------------------------------------------------
class IncrementalSegmentationModulePallas:
    def __init__(self, key, in_channels, body_channels, head_channels, classes,
                 interp_dtype=jnp.bfloat16):
        assert isinstance(classes, list)
        self.classes = classes
        self.tot_classes = int(sum(classes))
        self.head_channels = head_channels
        self.interp_dtype = interp_dtype
        k = jax.random.split(key, 6)
        s = 0.1
        # body: Conv2d(in_channels, body_channels, 1, stride=2) + ReLU
        self.wb = (s * jax.random.normal(k[0], (in_channels, body_channels))).astype(jnp.float32)
        self.bb = (s * jax.random.normal(k[1], (1, body_channels))).astype(jnp.float32)
        # head: Conv2d(body_channels, head_channels, 1)
        self.wh = (s * jax.random.normal(k[2], (body_channels, head_channels))).astype(jnp.float32)
        self.bh = (s * jax.random.normal(k[3], (1, head_channels))).astype(jnp.float32)
        # cls: ModuleList([Conv2d(head_channels, c, 1, bias=True) for c in classes]),
        # fused along the output-class axis (== torch.cat(out, dim=1))
        self.wc = (s * jax.random.normal(k[4], (head_channels, self.tot_classes))).astype(jnp.float32)
        self.bc = (s * jax.random.normal(k[5], (1, self.tot_classes))).astype(jnp.float32)

        # --- kernel-side fused / transposed parameters (exact algebra, f32) ---
        w_hc = self.wh @ self.wc                       # (Cb, T)   head followed by cls
        b_hc = self.bh @ self.wc + self.bc             # (1, T)
        self.wbT = jnp.asarray(self.wb.T)              # (Cb, Cin)
        self.bbT = jnp.asarray(self.bb.T)              # (Cb, 1)
        self.whcT = jnp.asarray(w_hc.T)                # (T, Cb)
        self.bhcT = jnp.asarray(b_hc.T)                # (T, 1)

        self._interp_cache = {}

    def _get_interp(self, H, W, KH, th):
        key = (H, W, KH, th)
        if key not in self._interp_cache:
            Hs, Ws = (H + 1) // 2, (W + 1) // 2       # stride-2 output sizes
            lh = bilinear_matrix(H, Hs)               # (Hout, Hs)
            lw = bilinear_matrix(W, Ws)               # (Wout, Ws)
            # Fold the stride-2 subsample (even rows / cols) into the interp
            # matrices: A = Lh @ Sh, B = Lw @ Sw  (exact).
            A = np.zeros((H, H), np.float32)
            A[:, 0:2 * Hs:2] = lh
            B = np.zeros((W, W), np.float32)
            B[:, 0:2 * Ws:2] = lw
            a3 = np.stack([A[:, k * th:(k + 1) * th] for k in range(KH)], axis=0)
            self._interp_cache[key] = (jnp.asarray(a3, dtype=self.interp_dtype),
                                       jnp.asarray(B.T, dtype=self.interp_dtype))
        return self._interp_cache[key]

    def forward(self, x):
        # x: (N, Cin, H, W)  -- NCHW, like the PyTorch module
        N, Cin, H, W = x.shape
        T = self.tot_classes
        Cb = self.wbT.shape[0]

        KH, th = _choose_row_chunks(N, H, W, Cin, Cb, T)
        chunk = th * W
        a3, bwT = self._get_interp(H, W, KH, th)

        # Free row-major view (no HBM copy, no stride-2 slice in the wrapper).
        x_flat = x.reshape(N, Cin, H * W)

        # TODO(synk): for very large H the (1, T, H, W) output block should also
        # be tiled over output rows to stay inside v7x's 64 MiB VMEM.
        out = pl.pallas_call(
            fused_seg_kernel,
            out_shape=jax.ShapeDtypeStruct((N, T, H, W), jnp.float32),
            grid_spec=pltpu.PrefetchScalarGridSpec(
                num_scalar_prefetch=0,
                grid=(N, KH),
                in_specs=[
                    pl.BlockSpec((1, Cin, chunk), lambda n, k: (n, 0, k)),
                    pl.BlockSpec((Cb, Cin), lambda n, k: (0, 0)),
                    pl.BlockSpec((Cb, 1), lambda n, k: (0, 0)),
                    pl.BlockSpec((T, Cb), lambda n, k: (0, 0)),
                    pl.BlockSpec((T, 1), lambda n, k: (0, 0)),
                    pl.BlockSpec((1, H, th), lambda n, k: (k, 0, 0)),
                    pl.BlockSpec((W, W), lambda n, k: (0, 0)),
                ],
                out_specs=pl.BlockSpec((1, T, H, W), lambda n, k: (n, 0, 0, 0)),
                scratch_shapes=[pltpu.VMEM((T, th, W), jnp.float32)],
            ),
            compiler_params=pltpu.CompilerParams(
                dimension_semantics=("parallel", "arbitrary"),
                vmem_limit_bytes=48 * 1024 * 1024),
        )(x_flat, self.wbT, self.bbT, self.whcT, self.bhcT, a3, bwT)
        return out, {}

    # pure-JAX reference (no Pallas, unfused head/cls, explicit subsample, f32)
    def reference(self, x):
        N, Cin, H, W = x.shape
        x_ds = x[:, :, ::2, ::2]
        Hs, Ws = x_ds.shape[2], x_ds.shape[3]
        xf = jnp.transpose(x_ds, (0, 2, 3, 1)).reshape(-1, Cin)
        h = jnp.maximum(xf @ self.wb + self.bb, 0.0)
        f = h @ self.wh + self.bh
        lg = f @ self.wc + self.bc
        small = jnp.transpose(lg.reshape(N, Hs, Ws, self.tot_classes), (0, 3, 1, 2))
        lh = jnp.asarray(bilinear_matrix(H, Hs))
        lw = jnp.asarray(bilinear_matrix(W, Ws))
        up = jnp.einsum("ik,nckl,jl->ncij", lh, small, lw)
        return up, {}


if __name__ == "__main__":
    key = jax.random.PRNGKey(0)
    k_param, k_x = jax.random.split(key)

    N, Cin, H, W = 2, 4, 16, 16
    body_channels, head_channels = 16, 32
    classes = [3, 2]          # tot_classes = 5

    module = IncrementalSegmentationModulePallas(k_param, Cin, body_channels,
                                                 head_channels, classes)
    x = jax.random.normal(k_x, (N, Cin, H, W), dtype=jnp.float32)

    sem_logits, extras = module.forward(x)
    sem_logits = jax.block_until_ready(sem_logits)

    ref_logits, _ = module.reference(x)
    # bf16 interp matmuls (f32 accumulate) give ~1e-3 abs error on these scales;
    # tolerance set with comfortable margin.
    np.testing.assert_allclose(np.asarray(sem_logits), np.asarray(ref_logits),
                               rtol=2e-2, atol=2e-2)
    assert sem_logits.shape == (N, sum(classes), H, W)
    # TODO(synk): real backbone/head submodules, warm-up (weight_old /
    # new_classifier_weight), cosine classifier, and multimodal-background
    # fusion branches are not exercised in this config.
    print("KERNEL_OK")
</pallas_src>

<mosaic_0001>
module attributes {stable_mosaic.version = 11 : i64} {
  func.func @fused_seg_kernel(%arg0: i32, %arg1: i32, %arg2: memref<1x4x128xf32, #tpu.memory_space<vmem>>, %arg3: memref<16x4xf32, #tpu.memory_space<vmem>>, %arg4: memref<16x1xf32, #tpu.memory_space<vmem>>, %arg5: memref<5x16xf32, #tpu.memory_space<vmem>>, %arg6: memref<5x1xf32, #tpu.memory_space<vmem>>, %arg7: memref<1x16x8xbf16, #tpu.memory_space<vmem>>, %arg8: memref<16x16xbf16, #tpu.memory_space<vmem>>, %arg9: memref<1x5x16x16xf32, #tpu.memory_space<vmem>>, %arg10: memref<5x8x16xf32, #tpu.memory_space<vmem>>) attributes {dimension_semantics = [#tpu.dimension_semantics<parallel>, #tpu.dimension_semantics<arbitrary>], iteration_bounds = array<i64: 2, 2>, scalar_prefetch = 0 : i64, scratch_operands = 1 : i64, tpu.core_type = #tpu.core_type<tc>, window_params = [{transform_indices = @transform_0, window_bounds = array<i64: 1, 4, 128>}, {pipeline_mode = #tpu.pipeline_mode<synchronous>, transform_indices = @transform_1, window_bounds = array<i64: 16, 4>}, {pipeline_mode = #tpu.pipeline_mode<synchronous>, transform_indices = @transform_2, window_bounds = array<i64: 16, 1>}, {pipeline_mode = #tpu.pipeline_mode<synchronous>, transform_indices = @transform_3, window_bounds = array<i64: 5, 16>}, {pipeline_mode = #tpu.pipeline_mode<synchronous>, transform_indices = @transform_4, window_bounds = array<i64: 5, 1>}, {transform_indices = @transform_5, window_bounds = array<i64: 1, 16, 8>}, {pipeline_mode = #tpu.pipeline_mode<synchronous>, transform_indices = @transform_6, window_bounds = array<i64: 16, 16>}, {transform_indices = @transform_7, window_bounds = array<i64: 1, 5, 16, 16>}]} {
    %c0_i32 = arith.constant 0 : i32
    %0 = arith.cmpi eq, %arg1, %c0_i32 : i32
    %1 = arith.extui %0 : i1 to i32
    %c0_i32_0 = arith.constant 0 : i32
    %2 = arith.cmpi ne, %1, %c0_i32_0 : i32
    scf.if %2 {
      %cst_84 = arith.constant 0.000000e+00 : f32
      %97 = vector.broadcast %cst_84 : f32 to vector<1x5x16x16xf32>
      %c0_85 = arith.constant 0 : index
      %c0_86 = arith.constant 0 : index
      %c0_87 = arith.constant 0 : index
      %c0_88 = arith.constant 0 : index
      %98 = vector.load %arg9[%c0_85, %c0_86, %c0_87, %c0_88] : memref<1x5x16x16xf32, #tpu.memory_space<vmem>>, vector<1x5x16x16xf32>
      tpu.vector_store %arg9[%c0_85, %c0_86, %c0_87, %c0_88], %97 {strides = array<i32>} : memref<1x5x16x16xf32, #tpu.memory_space<vmem>>, vector<1x5x16x16xf32>,
    } else {
    }
    %c0 = arith.constant 0 : index
    %c0_1 = arith.constant 0 : index
    %c0_2 = arith.constant 0 : index
    %3 = vector.load %arg2[%c0, %c0_1, %c0_2] : memref<1x4x128xf32, #tpu.memory_space<vmem>>, vector<1x4x128xf32>
    %4 = vector.shape_cast %3 : vector<1x4x128xf32> to vector<4x128xf32>
    %c0_3 = arith.constant 0 : index
    %c0_4 = arith.constant 0 : index
    %5 = vector.load %arg3[%c0_3, %c0_4] : memref<16x4xf32, #tpu.memory_space<vmem>>, vector<16x4xf32>
    %cst = arith.constant dense<0.000000e+00> : vector<16x128xf32>
    %6 = tpu.matmul %5, %4, %cst {dimension_numbers = #tpu.dot_dimension_numbers<[1], [0], [0], [1], [0, 0, 1, 1], [], []>} : vector<16x4xf32>, vector<4x128xf32>, vector<16x128xf32> -> vector<16x128xf32>
    %c0_5 = arith.constant 0 : index
    %c0_6 = arith.constant 0 : index
    %7 = vector.load %arg4[%c0_5, %c0_6] : memref<16x1xf32, #tpu.memory_space<vmem>>, vector<16x1xf32>
    %8 = vector.broadcast %7 : vector<16x1xf32> to vector<16x128xf32>
    %9 = arith.addf %6, %8 : vector<16x128xf32>
    %cst_7 = arith.constant 0.000000e+00 : f32
    %10 = vector.broadcast %cst_7 : f32 to vector<16x128xf32>
    %11 = arith.maximumf %9, %10 : vector<16x128xf32>
    %c0_8 = arith.constant 0 : index
    %c0_9 = arith.constant 0 : index
    %12 = vector.load %arg5[%c0_8, %c0_9] : memref<5x16xf32, #tpu.memory_space<vmem>>, vector<5x16xf32>
    %cst_10 = arith.constant dense<0.000000e+00> : vector<5x128xf32>
    %13 = tpu.matmul %12, %11, %cst_10 {dimension_numbers = #tpu.dot_dimension_numbers<[1], [0], [0], [1], [0, 0, 1, 1], [], []>} : vector<5x16xf32>, vector<16x128xf32>, vector<5x128xf32> -> vector<5x128xf32>
    %c0_11 = arith.constant 0 : index
    %c0_12 = arith.constant 0 : index
    %14 = vector.load %arg6[%c0_11, %c0_12] : memref<5x1xf32, #tpu.memory_space<vmem>>, vector<5x1xf32>
    %15 = vector.broadcast %14 : vector<5x1xf32> to vector<5x128xf32>
    %16 = arith.addf %13, %15 : vector<5x128xf32>
    %17 = vector.extract_strided_slice %16 {offsets = [0, 0], sizes = [5, 16], strides = [1, 1]} : vector<5x128xf32> to vector<5x16xf32>
    %c0_13 = arith.constant 0 : index
    %c0_14 = arith.constant 0 : index
    %c0_15 = arith.constant 0 : index
    %18 = vector.load %arg10[%c0_13, %c0_14, %c0_15] : memref<5x8x16xf32, #tpu.memory_space<vmem>>, vector<5x1x16xf32>
    %19 = vector.shape_cast %18 : vector<5x1x16xf32> to vector<5x16xf32>
    %20 = vector.shape_cast %17 : vector<5x16xf32> to vector<5x1x16xf32>
    tpu.vector_store %arg10[%c0_13, %c0_14, %c0_15], %20 {strides = array<i32>} : memref<5x8x16xf32, #tpu.memory_space<vmem>>, vector<5x1x16xf32>,
    %21 = vector.extract_strided_slice %16 {offsets = [0, 16], sizes = [5, 16], strides = [1, 1]} : vector<5x128xf32> to vector<5x16xf32>
    %c0_16 = arith.constant 0 : index
    %c1 = arith.constant 1 : index
    %c0_17 = arith.constant 0 : index
    %22 = vector.load %arg10[%c0_16, %c1, %c0_17] : memref<5x8x16xf32, #tpu.memory_space<vmem>>, vector<5x1x16xf32>
    %23 = vector.shape_cast %22 : vector<5x1x16xf32> to vector<5x16xf32>
    %24 = vector.shape_cast %21 : vector<5x16xf32> to vector<5x1x16xf32>
    tpu.vector_store %arg10[%c0_16, %c1, %c0_17], %24 {strides = array<i32>} : memref<5x8x16xf32, #tpu.memory_space<vmem>>, vector<5x1x16xf32>,
    %25 = vector.extract_strided_slice %16 {offsets = [0, 32], sizes = [5, 16], strides = [1, 1]} : vector<5x128xf32> to vector<5x16xf32>
    %c0_18 = arith.constant 0 : index
    %c2 = arith.constant 2 : index
    %c0_19 = arith.constant 0 : index
    %26 = vector.load %arg10[%c0_18, %c2, %c0_19] : memref<5x8x16xf32, #tpu.memory_space<vmem>>, vector<5x1x16xf32>
    %27 = vector.shape_cast %26 : vector<5x1x16xf32> to vector<5x16xf32>
    %28 = vector.shape_cast %25 : vector<5x16xf32> to vector<5x1x16xf32>
    tpu.vector_store %arg10[%c0_18, %c2, %c0_19], %28 {strides = array<i32>} : memref<5x8x16xf32, #tpu.memory_space<vmem>>, vector<5x1x16xf32>,
    %29 = vector.extract_strided_slice %16 {offsets = [0, 48], sizes = [5, 16], strides = [1, 1]} : vector<5x128xf32> to vector<5x16xf32>
    %c0_20 = arith.constant 0 : index
    %c3 = arith.constant 3 : index
    %c0_21 = arith.constant 0 : index
    %30 = vector.load %arg10[%c0_20, %c3, %c0_21] : memref<5x8x16xf32, #tpu.memory_space<vmem>>, vector<5x1x16xf32>
    %31 = vector.shape_cast %30 : vector<5x1x16xf32> to vector<5x16xf32>
    %32 = vector.shape_cast %29 : vector<5x16xf32> to vector<5x1x16xf32>
    tpu.vector_store %arg10[%c0_20, %c3, %c0_21], %32 {strides = array<i32>} : memref<5x8x16xf32, #tpu.memory_space<vmem>>, vector<5x1x16xf32>,
    %33 = vector.extract_strided_slice %16 {offsets = [0, 64], sizes = [5, 16], strides = [1, 1]} : vector<5x128xf32> to vector<5x16xf32>
    %c0_22 = arith.constant 0 : index
    %c4 = arith.constant 4 : index
    %c0_23 = arith.constant 0 : index
    %34 = vector.load %arg10[%c0_22, %c4, %c0_23] : memref<5x8x16xf32, #tpu.memory_space<vmem>>, vector<5x1x16xf32>
    %35 = vector.shape_cast %34 : vector<5x1x16xf32> to vector<5x16xf32>
    %36 = vector.shape_cast %33 : vector<5x16xf32> to vector<5x1x16xf32>
    tpu.vector_store %arg10[%c0_22, %c4, %c0_23], %36 {strides = array<i32>} : memref<5x8x16xf32, #tpu.memory_space<vmem>>, vector<5x1x16xf32>,
    %37 = vector.extract_strided_slice %16 {offsets = [0, 80], sizes = [5, 16], strides = [1, 1]} : vector<5x128xf32> to vector<5x16xf32>
    %c0_24 = arith.constant 0 : index
    %c5 = arith.constant 5 : index
    %c0_25 = arith.constant 0 : index
    %38 = vector.load %arg10[%c0_24, %c5, %c0_25] : memref<5x8x16xf32, #tpu.memory_space<vmem>>, vector<5x1x16xf32>
    %39 = vector.shape_cast %38 : vector<5x1x16xf32> to vector<5x16xf32>
    %40 = vector.shape_cast %37 : vector<5x16xf32> to vector<5x1x16xf32>
    tpu.vector_store %arg10[%c0_24, %c5, %c0_25], %40 {strides = array<i32>} : memref<5x8x16xf32, #tpu.memory_space<vmem>>, vector<5x1x16xf32>,
    %41 = vector.extract_strided_slice %16 {offsets = [0, 96], sizes = [5, 16], strides = [1, 1]} : vector<5x128xf32> to vector<5x16xf32>
    %c0_26 = arith.constant 0 : index
    %c6 = arith.constant 6 : index
    %c0_27 = arith.constant 0 : index
    %42 = vector.load %arg10[%c0_26, %c6, %c0_27] : memref<5x8x16xf32, #tpu.memory_space<vmem>>, vector<5x1x16xf32>
    %43 = vector.shape_cast %42 : vector<5x1x16xf32> to vector<5x16xf32>
    %44 = vector.shape_cast %41 : vector<5x16xf32> to vector<5x1x16xf32>
    tpu.vector_store %arg10[%c0_26, %c6, %c0_27], %44 {strides = array<i32>} : memref<5x8x16xf32, #tpu.memory_space<vmem>>, vector<5x1x16xf32>,
    %45 = vector.extract_strided_slice %16 {offsets = [0, 112], sizes = [5, 16], strides = [1, 1]} : vector<5x128xf32> to vector<5x16xf32>
    %c0_28 = arith.constant 0 : index
    %c7 = arith.constant 7 : index
    %c0_29 = arith.constant 0 : index
    %46 = vector.load %arg10[%c0_28, %c7, %c0_29] : memref<5x8x16xf32, #tpu.memory_space<vmem>>, vector<5x1x16xf32>
    %47 = vector.shape_cast %46 : vector<5x1x16xf32> to vector<5x16xf32>
    %48 = vector.shape_cast %45 : vector<5x16xf32> to vector<5x1x16xf32>
    tpu.vector_store %arg10[%c0_28, %c7, %c0_29], %48 {strides = array<i32>} : memref<5x8x16xf32, #tpu.memory_space<vmem>>, vector<5x1x16xf32>,
    %c0_30 = arith.constant 0 : index
    %c0_31 = arith.constant 0 : index
    %c0_32 = arith.constant 0 : index
    %49 = vector.load %arg10[%c0_30, %c0_31, %c0_32] : memref<5x8x16xf32, #tpu.memory_space<vmem>>, vector<5x8x16xf32>
    %50 = vector.shape_cast %49 : vector<5x8x16xf32> to vector<40x16xf32>
    %51 = arith.truncf %50 : vector<40x16xf32> to vector<40x16xbf16>
    %c0_33 = arith.constant 0 : index
    %c0_34 = arith.constant 0 : index
    %52 = vector.load %arg8[%c0_33, %c0_34] : memref<16x16xbf16, #tpu.memory_space<vmem>>, vector<16x16xbf16>
    %cst_35 = arith.constant dense<0.000000e+00> : vector<40x16xf32>
    %53 = tpu.matmul %51, %52, %cst_35 {dimension_numbers = #tpu.dot_dimension_numbers<[1], [0], [0], [1], [0, 0, 1, 1], [], []>} : vector<40x16xbf16>, vector<16x16xbf16>, vector<40x16xf32> -> vector<40x16xf32>
    %54 = arith.truncf %53 : vector<40x16xf32> to vector<40x16xbf16>
    %c0_36 = arith.constant 0 : index
    %c0_37 = arith.constant 0 : index
    %c0_38 = arith.constant 0 : index
    %55 = vector.load %arg7[%c0_36, %c0_37, %c0_38] : memref<1x16x8xbf16, #tpu.memory_space<vmem>>, vector<1x16x8xbf16>
    %56 = vector.shape_cast %55 : vector<1x16x8xbf16> to vector<16x8xbf16>
    %57 = vector.extract_strided_slice %54 {offsets = [0, 0], sizes = [8, 16], strides = [1, 1]} : vector<40x16xbf16> to vector<8x16xbf16>
    %cst_39 = arith.constant dense<0.000000e+00> : vector<16x16xf32>
    %58 = tpu.matmul %56, %57, %cst_39 {dimension_numbers = #tpu.dot_dimension_numbers<[1], [0], [0], [1], [0, 0, 1, 1], [], []>} : vector<16x8xbf16>, vector<8x16xbf16>, vector<16x16xf32> -> vector<16x16xf32>
    %c0_40 = arith.constant 0 : index
    %c0_41 = arith.constant 0 : index
    %c0_42 = arith.constant 0 : index
    %c0_43 = arith.constant 0 : index
    %59 = vector.load %arg9[%c0_40, %c0_41, %c0_42, %c0_43] : memref<1x5x16x16xf32, #tpu.memory_space<vmem>>, vector<1x1x16x16xf32>
    %60 = vector.shape_cast %59 : vector<1x1x16x16xf32> to vector<16x16xf32>
    %61 = arith.addf %60, %58 : vector<16x16xf32>
    %c0_44 = arith.constant 0 : index
    %c0_45 = arith.constant 0 : index
    %c0_46 = arith.constant 0 : index
    %c0_47 = arith.constant 0 : index
    %62 = vector.load %arg9[%c0_44, %c0_45, %c0_46, %c0_47] : memref<1x5x16x16xf32, #tpu.memory_space<vmem>>, vector<1x1x16x16xf32>
    %63 = vector.shape_cast %62 : vector<1x1x16x16xf32> to vector<16x16xf32>
    %64 = vector.shape_cast %61 : vector<16x16xf32> to vector<1x1x16x16xf32>
    tpu.vector_store %arg9[%c0_44, %c0_45, %c0_46, %c0_47], %64 {strides = array<i32>} : memref<1x5x16x16xf32, #tpu.memory_space<vmem>>, vector<1x1x16x16xf32>,
    %65 = vector.extract_strided_slice %54 {offsets = [8, 0], sizes = [8, 16], strides = [1, 1]} : vector<40x16xbf16> to vector<8x16xbf16>
    %cst_48 = arith.constant dense<0.000000e+00> : vector<16x16xf32>
    %66 = tpu.matmul %56, %65, %cst_48 {dimension_numbers = #tpu.dot_dimension_numbers<[1], [0], [0], [1], [0, 0, 1, 1], [], []>} : vector<16x8xbf16>, vector<8x16xbf16>, vector<16x16xf32> -> vector<16x16xf32>
    %c0_49 = arith.constant 0 : index
    %c1_50 = arith.constant 1 : index
    %c0_51 = arith.constant 0 : index
    %c0_52 = arith.constant 0 : index
    %67 = vector.load %arg9[%c0_49, %c1_50, %c0_51, %c0_52] : memref<1x5x16x16xf32, #tpu.memory_space<vmem>>, vector<1x1x16x16xf32>
    %68 = vector.shape_cast %67 : vector<1x1x16x16xf32> to vector<16x16xf32>
    %69 = arith.addf %68, %66 : vector<16x16xf32>
    %c0_53 = arith.constant 0 : index
    %c1_54 = arith.constant 1 : index
    %c0_55 = arith.constant 0 : index
    %c0_56 = arith.constant 0 : index
    %70 = vector.load %arg9[%c0_53, %c1_54, %c0_55, %c0_56] : memref<1x5x16x16xf32, #tpu.memory_space<vmem>>, vector<1x1x16x16xf32>
    %71 = vector.shape_cast %70 : vector<1x1x16x16xf32> to vector<16x16xf32>
    %72 = vector.shape_cast %69 : vector<16x16xf32> to vector<1x1x16x16xf32>
    tpu.vector_store %arg9[%c0_53, %c1_54, %c0_55, %c0_56], %72 {strides = array<i32>} : memref<1x5x16x16xf32, #tpu.memory_space<vmem>>, vector<1x1x16x16xf32>,
    %73 = vector.extract_strided_slice %54 {offsets = [16, 0], sizes = [8, 16], strides = [1, 1]} : vector<40x16xbf16> to vector<8x16xbf16>
    %cst_57 = arith.constant dense<0.000000e+00> : vector<16x16xf32>
    %74 = tpu.matmul %56, %73, %cst_57 {dimension_numbers = #tpu.dot_dimension_numbers<[1], [0], [0], [1], [0, 0, 1, 1], [], []>} : vector<16x8xbf16>, vector<8x16xbf16>, vector<16x16xf32> -> vector<16x16xf32>
    %c0_58 = arith.constant 0 : index
    %c2_59 = arith.constant 2 : index
    %c0_60 = arith.constant 0 : index
    %c0_61 = arith.constant 0 : index
    %75 = vector.load %arg9[%c0_58, %c2_59, %c0_60, %c0_61] : memref<1x5x16x16xf32, #tpu.memory_space<vmem>>, vector<1x1x16x16xf32>
    %76 = vector.shape_cast %75 : vector<1x1x16x16xf32> to vector<16x16xf32>
    %77 = arith.addf %76, %74 : vector<16x16xf32>
    %c0_62 = arith.constant 0 : index
    %c2_63 = arith.constant 2 : index
    %c0_64 = arith.constant 0 : index
    %c0_65 = arith.constant 0 : index
    %78 = vector.load %arg9[%c0_62, %c2_63, %c0_64, %c0_65] : memref<1x5x16x16xf32, #tpu.memory_space<vmem>>, vector<1x1x16x16xf32>
    %79 = vector.shape_cast %78 : vector<1x1x16x16xf32> to vector<16x16xf32>
    %80 = vector.shape_cast %77 : vector<16x16xf32> to vector<1x1x16x16xf32>
    tpu.vector_store %arg9[%c0_62, %c2_63, %c0_64, %c0_65], %80 {strides = array<i32>} : memref<1x5x16x16xf32, #tpu.memory_space<vmem>>, vector<1x1x16x16xf32>,
    %81 = vector.extract_strided_slice %54 {offsets = [24, 0], sizes = [8, 16], strides = [1, 1]} : vector<40x16xbf16> to vector<8x16xbf16>
    %cst_66 = arith.constant dense<0.000000e+00> : vector<16x16xf32>
    %82 = tpu.matmul %56, %81, %cst_66 {dimension_numbers = #tpu.dot_dimension_numbers<[1], [0], [0], [1], [0, 0, 1, 1], [], []>} : vector<16x8xbf16>, vector<8x16xbf16>, vector<16x16xf32> -> vector<16x16xf32>
    %c0_67 = arith.constant 0 : index
    %c3_68 = arith.constant 3 : index
    %c0_69 = arith.constant 0 : index
    %c0_70 = arith.constant 0 : index
    %83 = vector.load %arg9[%c0_67, %c3_68, %c0_69, %c0_70] : memref<1x5x16x16xf32, #tpu.memory_space<vmem>>, vector<1x1x16x16xf32>
    %84 = vector.shape_cast %83 : vector<1x1x16x16xf32> to vector<16x16xf32>
    %85 = arith.addf %84, %82 : vector<16x16xf32>
    %c0_71 = arith.constant 0 : index
    %c3_72 = arith.constant 3 : index
    %c0_73 = arith.constant 0 : index
    %c0_74 = arith.constant 0 : index
    %86 = vector.load %arg9[%c0_71, %c3_72, %c0_73, %c0_74] : memref<1x5x16x16xf32, #tpu.memory_space<vmem>>, vector<1x1x16x16xf32>
    %87 = vector.shape_cast %86 : vector<1x1x16x16xf32> to vector<16x16xf32>
    %88 = vector.shape_cast %85 : vector<16x16xf32> to vector<1x1x16x16xf32>
    tpu.vector_store %arg9[%c0_71, %c3_72, %c0_73, %c0_74], %88 {strides = array<i32>} : memref<1x5x16x16xf32, #tpu.memory_space<vmem>>, vector<1x1x16x16xf32>,
    %89 = vector.extract_strided_slice %54 {offsets = [32, 0], sizes = [8, 16], strides = [1, 1]} : vector<40x16xbf16> to vector<8x16xbf16>
    %cst_75 = arith.constant dense<0.000000e+00> : vector<16x16xf32>
    %90 = tpu.matmul %56, %89, %cst_75 {dimension_numbers = #tpu.dot_dimension_numbers<[1], [0], [0], [1], [0, 0, 1, 1], [], []>} : vector<16x8xbf16>, vector<8x16xbf16>, vector<16x16xf32> -> vector<16x16xf32>
    %c0_76 = arith.constant 0 : index
    %c4_77 = arith.constant 4 : index
    %c0_78 = arith.constant 0 : index
    %c0_79 = arith.constant 0 : index
    %91 = vector.load %arg9[%c0_76, %c4_77, %c0_78, %c0_79] : memref<1x5x16x16xf32, #tpu.memory_space<vmem>>, vector<1x1x16x16xf32>
    %92 = vector.shape_cast %91 : vector<1x1x16x16xf32> to vector<16x16xf32>
    %93 = arith.addf %92, %90 : vector<16x16xf32>
    %c0_80 = arith.constant 0 : index
    %c4_81 = arith.constant 4 : index
    %c0_82 = arith.constant 0 : index
    %c0_83 = arith.constant 0 : index
    %94 = vector.load %arg9[%c0_80, %c4_81, %c0_82, %c0_83] : memref<1x5x16x16xf32, #tpu.memory_space<vmem>>, vector<1x1x16x16xf32>
    %95 = vector.shape_cast %94 : vector<1x1x16x16xf32> to vector<16x16xf32>
    %96 = vector.shape_cast %93 : vector<16x16xf32> to vector<1x1x16x16xf32>
    tpu.vector_store %arg9[%c0_80, %c4_81, %c0_82, %c0_83], %96 {strides = array<i32>} : memref<1x5x16x16xf32, #tpu.memory_space<vmem>>, vector<1x1x16x16xf32>,
    return
  }
  func.func @transform_0(%arg0: i32, %arg1: i32) -> (i32, i32, i32) {
    %c0_i32 = arith.constant 0 : i32
    %c0_i32_0 = arith.constant 0 : i32
    return %arg0, %c0_i32, %arg1 : i32, i32, i32
  }
  func.func @transform_1(%arg0: i32, %arg1: i32) -> (i32, i32) {
    %c0_i32 = arith.constant 0 : i32
    %c0_i32_0 = arith.constant 0 : i32
    %c0_i32_1 = arith.constant 0 : i32
    return %c0_i32, %c0_i32_0 : i32, i32
  }
  func.func @transform_2(%arg0: i32, %arg1: i32) -> (i32, i32) {
    %c0_i32 = arith.constant 0 : i32
    %c0_i32_0 = arith.constant 0 : i32
    %c0_i32_1 = arith.constant 0 : i32
    return %c0_i32, %c0_i32_0 : i32, i32
  }
  func.func @transform_3(%arg0: i32, %arg1: i32) -> (i32, i32) {
    %c0_i32 = arith.constant 0 : i32
    %c0_i32_0 = arith.constant 0 : i32
    %c0_i32_1 = arith.constant 0 : i32
    return %c0_i32, %c0_i32_0 : i32, i32
  }
  func.func @transform_4(%arg0: i32, %arg1: i32) -> (i32, i32) {
    %c0_i32 = arith.constant 0 : i32
    %c0_i32_0 = arith.constant 0 : i32
    %c0_i32_1 = arith.constant 0 : i32
    return %c0_i32, %c0_i32_0 : i32, i32
  }
  func.func @transform_5(%arg0: i32, %arg1: i32) -> (i32, i32, i32) {
    %c0_i32 = arith.constant 0 : i32
    %c0_i32_0 = arith.constant 0 : i32
    %c0_i32_1 = arith.constant 0 : i32
    return %arg1, %c0_i32, %c0_i32_0 : i32, i32, i32
  }
  func.func @transform_6(%arg0: i32, %arg1: i32) -> (i32, i32) {
    %c0_i32 = arith.constant 0 : i32
    %c0_i32_0 = arith.constant 0 : i32
    %c0_i32_1 = arith.constant 0 : i32
    return %c0_i32, %c0_i32_0 : i32, i32
  }
  func.func @transform_7(%arg0: i32, %arg1: i32) -> (i32, i32, i32, i32) {
    %c0_i32 = arith.constant 0 : i32
    %c0_i32_0 = arith.constant 0 : i32
    %c0_i32_1 = arith.constant 0 : i32
    %c0_i32_2 = arith.constant 0 : i32
    return %arg0, %c0_i32, %c0_i32_0, %c0_i32_1 : i32, i32, i32, i32
  }
}

</mosaic_0001>

<bundles_post_ra>
// kernel: tpu_custom_call.1
= control target key start
LH: loop header
LB: loop body
LE: loop exit
PB: predicated region body
PF: predicated region fallthrough
CT: control target
= control target key end

     0   :  { %12 = vsyncpa [#allocation4], 0  ;;  %s1427_s0 = inlined_call_operand.vmem [shape: f32[2,4,256], index: 0, kind: input, shape index: {}]   ;;  %s1428_s1 = inlined_call_operand.vmem [shape: f32[16,4], index: 1, kind: input, shape index: {}]   ;;  %s1429_s2 = inlined_call_operand.vmem [shape: f32[16,1], index: 2, kind: input, shape index: {}]   ;;  %s1430_s3 = inlined_call_operand.vmem [shape: f32[5,16], index: 3, kind: input, shape index: {}]   ;;  %s1431_s4 = inlined_call_operand.vmem [shape: f32[5,1], index: 4, kind: input, shape index: {}]   ;;  %s1432_s5 = inlined_call_operand.vmem [shape: bf16[2,16,8], index: 5, kind: input, shape index: {}]   ;;  %s1433_s6 = inlined_call_operand.vmem [shape: bf16[16,16], index: 6, kind: input, shape index: {}]   ;;  %s1434_s7 = inlined_call_operand.hbm [shape: f32[2,5,16,16], index: 7, kind: output, shape index: {}]  }
   0x1   :  { %14 = vsyncpa [#allocation4 + $0x1], 0  ;;  %s1153_s24 = smov 0   ;;  %s1155_s25 = smov 0  }
   0x2   :  { %s1157_s26 = smov 0   ;;  %s1159_s27 = smov 0  }
   0x3   :  { %s1161_s28 = smov 0   ;;  %s1163_s29 = smov 0  }
   0x4   :  { %s1165_s30 = smov 0   ;;  %s1167_s8 = smov 0  }
   0x5 LB: > { %1438 = sst [smem:[#allocation6_spill]] %s1092_s29  ;;  %s868_s9 = sadd.s32 4294967295, %s1100_s8   ;;  %s1100_s8 = sphi %s1167_s8, %s20_s8   ;;  %s1096_s30 = sphi %s1165_s30, %s1449_s30   ;;  %s1092_s29 = sphi %s1163_s29, %s1448_s29   ;;  %s1088_s28 = sphi %s1161_s28, %s1447_s28   ;;  %s1084_s27 = sphi %s1159_s27, %s1446_s27   ;;  %s1080_s26 = sphi %s1157_s26, %s1452_s26   ;;  %s1076_s25 = sphi %s1155_s25, %s1451_s25   ;;  %s1072_s24 = sphi %s1153_s24, %s1450_s24  }
   0x6   : > { %1439 = sst [smem:[#allocation7_spill]] %s1096_s30  ;;  %s869_s10 = sadd.s32 4294967294, %s1100_s8  }
   0x7   : > { %s29_s11 = sadd.s32 1, %s1092_s29  ;;  %s32_s12 = sadd.s32 1, %s1096_s30 }
   0x8   : > { %p30_p0 = scmp.ge.s32.totalorder %s29_s11, 2  ;;  %p208_p1 = scmp.ne.s32.totalorder %s1080_s26, %s1076_s25 }
   0x9   : > { %p209_p2 = scmp.eq.s32.totalorder %s868_s9, 3  ;;  %p214_p4 = scmp.ne.s32.totalorder %s1076_s25, %s1072_s24 }
   0xa   : > { %s1454_s11 = smov (%p30_p0, %s29_s11), 0  ;;  %s1456_s12 = smov (!%p30_p0, %s32_s12), %s1096_s30 }
   0xb   : > { %1440 = sst [smem:[#allocation8_spill]] %s1454_s11  ;;  %p1202_p3 = por %p209_p2, %p208_p1 }
   0xc   : > { %p34_p5 = scmp.ge.s32.totalorder %s1456_s12, 2  ;;  %p215_p6 = scmp.eq.s32.totalorder %s869_s10, 3 }
   0xd   : > { %p872_p7 = scmp.ge.s32.totalorder %s1100_s8, 1  ;;  %p267_p8 = scmp.lt.s32.totalorder %s1100_s8, 5 }
   0xe   : > { %s1458_s12 = smov (%p34_p5, %s1456_s12), 0  ;;  %p1212_p9 = por %p215_p6, %p214_p4 }
   0xf   : > { %1442 = sst [smem:[#allocation9_spill]] %s1458_s12  ;;  %p268_p10 = pnand %p872_p7, %p267_p8 }
  0x10   : > { %s195_s15 = ssub.s32 %s1096_s30, %s1458_s12  ;;  %s198_s16 = sadd.s32 1, %s1080_s26 }
  0x11   : > { %p196_p11 = scmp.eq.s32.totalorder %s195_s15, 0  ;;  %271 = sbr.rel (%p268_p10) target bundleno = 809 (0x329), region = 48 }
  0x12   : > { %s304_s18 = sand.u32 (!%p268_p10), 1, %s1076_s25   ;;  %p307_p12 = scmp.lt.s32.totalorder (!%p268_p10), %s1088_s28, 1 }
  0x13   : > { %s1220_s17 = scalar_select %p196_p11, %s1080_s26, %s198_s16  }
  0x14   : > { %s920_s19 = smul.u32 (!%p268_p10), 80, %s304_s18  ;;  %p309_p13 = scmp.lt.s32.totalorder (!%p268_p10), %s1084_s27, 1 }
  0x15   : > { %1444 = sst [smem:[#allocation10_spill]] %s1220_s17  ;;  %p877_p0 = scmp.ne.s32.totalorder (!%p268_p10), %s1084_s27, 0 }
  0x16   : > { %s308_s20 = scalar_select %p307_p12, %s1088_s28, 1 }
  0x17   : > { %s310_s21 = scalar_select %p309_p13, %s1084_s27, 1 }
  0x18   : > { %s873_s22 = sshll.u32 %s308_s20, 1  ;;  %s1237_s17 = scalar_lea.vmem [#allocation3], %s920_s19 }
  0x19   : > { %s312_s23 = sadd.s32 %s873_s22, %s310_s21  ;;  %s917_s9 = sshll.u32 %s310_s21, 3 }
  0x1a   : > { %s874_s10 = sshll.u32 %s312_s23, 2  ;;  %s1232_s12 = scalar_lea.vmem %s1432_s5, %s917_s9 }
  0x1b   : > { %s314_s29 = scalar_lea.vmem %s1427_s0, %s874_s10  ;;  %324 = sbr.rel (%p877_p0) target bundleno = 43 (0x2b), region = 52 }
  0x20   : > { %vm325_vm0 = vcmask 130048   ;;  %v1102_v0 = vmov 0.0  }
  0x21   : > { %326 = vst.msk [vmem:[%s1237_s17] sm:$0xff] %vm325_vm0, %v1102_v0 }
  0x22   : > { %327 = vst.msk [vmem:[%s1237_s17 + $0x8] sm:$0xff] %vm325_vm0, %v1102_v0 }
  0x23   : > { %328 = vst.msk [vmem:[%s1237_s17 + $0x10] sm:$0xff] %vm325_vm0, %v1102_v0 }
  0x24   : > { %329 = vst.msk [vmem:[%s1237_s17 + $0x18] sm:$0xff] %vm325_vm0, %v1102_v0 }
  0x25   : > { %330 = vst.msk [vmem:[%s1237_s17 + $0x20] sm:$0xff] %vm325_vm0, %v1102_v0 }
  0x26   : > { %331 = vst.msk [vmem:[%s1237_s17 + $0x28] sm:$0xff] %vm325_vm0, %v1102_v0 }
  0x27   : > { %332 = vst.msk [vmem:[%s1237_s17 + $0x30] sm:$0xff] %vm325_vm0, %v1102_v0 }
  0x28   : > { %333 = vst.msk [vmem:[%s1237_s17 + $0x38] sm:$0xff] %vm325_vm0, %v1102_v0 }
  0x29   : > { %334 = vst.msk [vmem:[%s1237_s17 + $0x40] sm:$0xff] %vm325_vm0, %v1102_v0 }
  0x2a   : > { %335 = vst.msk [vmem:[%s1237_s17 + $0x48] sm:$0xff] %vm325_vm0, %v1102_v0 }
  0x2b PF: > { %v336_v1 = vld [vmem:[%s314_s29] sm:$0xf]  ;;  %vm358_vm1 = vcmask 1043456   ;;  %vm351_vm2 = vcmask 31744   ;;  %v1103_v3 = vmov 0   ;;  %v340_v4 = vld [vmem:[%s1429_s2 + $0x8] sm:$0xff] }
  0x2c   : > { %v337_v2 = vld [vmem:[%s1428_s1] sm:$0xff]  ;;  %878 = vmatpush.msk.msra.mxu0 %vm358_vm1, %v336_v1  ;;  %1004 = vset.pattern.permute.xlu0 %v1103_v3  ;;  %v338_v5 = vld [vmem:[%s1428_s1 + $0x8] sm:$0xff]  ;;  %vm394_vm3 = vcmask 130048   ;;  %vm427_vm4 = vcmask 122880   ;;  %s1104_s16 = smov 64   ;;  %s1105_s27 = smov 96  }
  0x2d   : > { %879 = vmatmul.msk.f32.vlgmr.msra.gmra.mxu0 %vm351_vm2, %v337_v2  ;;  %348 = vperm.xlu0 %1004, %v340_v4   ;;  %v339_v6 = vld [vmem:[%s1429_s2] sm:$0xff]  ;;  %s1106_s30 = smov 112   ;;  %s1107_s11 = smov 16   ;;  %vm638_vm5 = vcmask 64512  }
  0x2e   : > { %1005 = vset.pattern.permute.xlu1 %v1103_v3  ;;  %v388_v7 = vld [vmem:[%s1431_s4] sm:$0x1f]  ;;  %s1108_s19 = smov 48   ;;  %s1109_s20 = smov 80  }
  0x2f   : > { %391 = vperm.xlu1 %1005, %v388_v7   ;;  %v387_v16 = vld [vmem:[%s1430_s3] sm:$0x1f]  ;;  %s1110_s21 = smov 32   ;;  %s774_s15 = sshll.u32 %s1237_s17, 4  ;;  %s775_s15 = int_to_ptr.vmem [resolvable:$true] %s774_s15 }
  0x30   : > { %v918_v35 = vld [vmem:[%s1433_s6] sm:$0xff] }
  0x31   : > { %610 = vmatpush.bf16.msra.mxu2 %v918_v35 }
  0x35   : > { %880 = vmatmul.msk.f32.gmra.mxu0 %vm351_vm2, %v338_v5  ;;  %343 = vperm.xlu0 %1004, %v339_v6  }
  0x9f   : > { %v349_v8 = vpop.permute.xlu0 %348 }
  0xa1   : > { %v392_v17 = vpop.permute.xlu1 %391 }
  0xa7   : > { %v344_v10 = vpop.permute.xlu0 %343 }
  0xaa   : > { %v379_v9 = vpop.f32.mrf.mxu0 }
  0xab   : > { %v380_v12 = vadd.f32 %v379_v9, %v344_v10 }
  0xad   : > { %v385_v15 = vmax.f32 %v380_v12, 0.0  ;;  %v919_v12 = vld [vmem:[%s1232_s12] sm:$0xff]  ;;  %s921_s12 = smul.u32 80, %s1088_s28  ;;  %s762_s28 = scalar_lea.sflag [#allocation4], %s304_s18 }
  0xaf   : > { %s773_s10 = scalar_lea.hbm %s1434_s7, %s921_s12 }
  0xb2   : > { %v382_v11 = vpop.f32.mrf.mxu0 }
  0xb3   : > { %v383_v13 = vadd.f32 %v382_v11, %v349_v8 }
  0xb5   : > { %v386_v14 = vmax.f32 %v383_v13, 0.0 }
  0xb7   : > { %412 = vmatpush.msra.mxu1 %v386_v14 }
  0xb9   : > { %413 = vmatpush.msra.mxu1 %v385_v15 }
  0xba   : > { %881 = vmatmul.msk.f32.vlgmr.msra.gmra.mxu1 %vm394_vm3, %v387_v16 }
 0x137   : > { %v415_v18 = vpop.f32.mrf.mxu1 }
 0x138   : > { %v416_v19 = vadd.f32 %v415_v18, %v392_v17 }
 0x13a   : > { %v419_v20 = vrot.slane %v416_v19, 1  ;;  %v420_v21 = vrot.slane %v416_v19, 2  ;;  %v421_v22 = vrot.slane %v416_v19, 3  ;;  %428 = vst.msk [vmem:[#allocation2] sm:$0x1] %vm427_vm4, %v416_v19  ;;  %v422_v23 = vrot.slane %v416_v19, 4 }
 0x13b   : > { %v433_v24 = vperm.slane %v416_v19, 0 }
 0x13c   : > { %429 = vst.msk [vmem:[#allocation2 + $0x8] sm:$0x1] %vm427_vm4, %v419_v20  ;;  %v434_v25 = vperm.slane %v419_v20, 0  ;;  %v436_v26 = vperm.slane %v421_v22, 0  ;;  %v435_v27 = vperm.slane %v420_v21, 0  ;;  %v437_v28 = vperm.slane %v422_v23, 0 }
 0x13d   : > { %430 = vst.msk [vmem:[#allocation2 + $0x10] sm:$0x1] %vm427_vm4, %v420_v21  ;;  %498 = vrot.lane.b32.xlu0 %v433_v24, %s1104_s16  ;;  %458 = vrot.lane.b32.xlu2 %v433_v24, %s1105_s27 }
 0x13e   : > { %431 = vst.msk [vmem:[#allocation2 + $0x18] sm:$0x1] %vm427_vm4, %v421_v22  ;;  %438 = vrot.lane.b32.xlu1 %v433_v24, %s1106_s30 }
 0x13f   : > { %432 = vst.msk [vmem:[#allocation2 + $0x20] sm:$0x1] %vm427_vm4, %v422_v23 }
 0x145   : > { %558 = vrot.lane.b32.xlu0 %v433_v24, %s1107_s11  ;;  %518 = vrot.lane.b32.xlu2 %v433_v24, %s1108_s19 }
 0x146   : > { %478 = vrot.lane.b32.xlu1 %v433_v24, %s1109_s20 }
 0x14d   : > { %460 = vrot.lane.b32.xlu0 %v434_v25, %s1105_s27  ;;  %440 = vrot.lane.b32.xlu2 %v434_v25, %s1106_s30 }
 0x14e   : > { %538 = vrot.lane.b32.xlu1 %v433_v24, %s1110_s21 }
 0x155   : > { %520 = vrot.lane.b32.xlu0 %v434_v25, %s1108_s19  ;;  %480 = vrot.lane.b32.xlu2 %v434_v25, %s1109_s20 }
 0x156   : > { %500 = vrot.lane.b32.xlu1 %v434_v25, %s1104_s16 }
 0x15d   : > { %444 = vrot.lane.b32.xlu0 %v436_v26, %s1106_s30  ;;  %540 = vrot.lane.b32.xlu2 %v434_v25, %s1110_s21 }
 0x15e   : > { %560 = vrot.lane.b32.xlu1 %v434_v25, %s1107_s11 }
 0x165   : > { %482 = vrot.lane.b32.xlu0 %v435_v27, %s1109_s20  ;;  %442 = vrot.lane.b32.xlu2 %v435_v27, %s1106_s30 }
 0x166   : > { %462 = vrot.lane.b32.xlu1 %v435_v27, %s1105_s27 }
 0x16d   : > { %504 = vrot.lane.b32.xlu0 %v436_v26, %s1104_s16  ;;  %464 = vrot.lane.b32.xlu2 %v436_v26, %s1105_s27 }
 0x16e   : > { %484 = vrot.lane.b32.xlu1 %v436_v26, %s1109_s20 }
 0x175   : > { %542 = vrot.lane.b32.xlu0 %v435_v27, %s1110_s21  ;;  %502 = vrot.lane.b32.xlu2 %v435_v27, %s1104_s16 }
 0x176   : > { %522 = vrot.lane.b32.xlu1 %v435_v27, %s1108_s19 }
 0x17d   : > { %564 = vrot.lane.b32.xlu0 %v436_v26, %s1107_s11  ;;  %524 = vrot.lane.b32.xlu2 %v436_v26, %s1108_s19 }
 0x17e   : > { %544 = vrot.lane.b32.xlu1 %v436_v26, %s1110_s21  ;;  %v659_v26 = vld [vmem:[%s1237_s17] sm:$0xff] }
 0x185   : > { %486 = vrot.lane.b32.xlu0 %v437_v28, %s1109_s20  ;;  %562 = vrot.lane.b32.xlu2 %v435_v27, %s1107_s11  ;;  %s1026_s20 = scalar_lea.hbm %s1434_s7, 160 }
 0x186   : > { %446 = vrot.lane.b32.xlu1 %v437_v28, %s1106_s30 }
 0x18d   : > { %546 = vrot.lane.b32.xlu0 %v437_v28, %s1110_s21  ;;  %466 = vrot.lane.b32.xlu2 %v437_v28, %s1105_s27 }
 0x18e   : > { %506 = vrot.lane.b32.xlu1 %v437_v28, %s1104_s16  ;;  %s776_s16 = sshll.u32 %s773_s10, 4  ;;  %s777_s16 = int_to_ptr.hbm [resolvable:$true] %s776_s16 }
 0x18f   : > { %s1020_s27 = sshra.s32 %s777_s16, 4  ;;  %s1021_s27 = int_to_ptr.hbm [resolvable:$true] %s1020_s27 }
 0x190   : > { %s1022_s30 = scalar_lea.hbm %s1021_s27, 80  ;;  %p1027_p5 = scmp.lt.s32.totalorder %s1021_s27, %s1434_s7 }
 0x191   : > { %p1023_p1 = scmp.ne.s32.totalorder %s1021_s27, %s1022_s30  ;;  %p1028_p6 = scmp.lt.s32.totalorder %s1026_s20, %s1022_s30 }
 0x193   : > { %p1024_p2 = pnand %p1023_p1, %p1202_p3  ;;  %p1029_p7 = por %p1028_p6, %p1027_p5 }
 0x195   : > { %526 = vrot.lane.b32.xlu2 %v437_v28, %s1108_s19  ;;  %p1025_p4 = pneg %p1024_p2 }
 0x196   : > { %566 = vrot.lane.b32.xlu1 %v437_v28, %s1107_s11  ;;  %v895_v28 = vld [vmem:[%s1237_s17 + $0x10] sm:$0xff] }
 0x197   : > { %v459_v29 = vpop.permute.xlu2 %458  ;;  %p1030_p8 = pnand %p1029_p7, %p1025_p4 }
 0x198   : > { %473 = vst.msk [vmem:[#allocation2 + $0x2] sm:$0x1] %vm427_vm4, %v459_v29 }
 0x19f   : > { %v519_v30 = vpop.permute.xlu2 %518 }
 0x1a0   : > { %533 = vst.msk [vmem:[#allocation2 + $0x5] sm:$0x1] %vm427_vm4, %v519_v30 }
 0x1a7   : > { %v441_v31 = vpop.permute.xlu2 %440 }
 0x1a8   : > { %454 = vst.msk [vmem:[#allocation2 + $0x9] sm:$0x1] %vm427_vm4, %v441_v31 }
 0x1af   : > { %v499_v32 = vpop.permute.xlu0 %498  ;;  %v481_v33 = vpop.permute.xlu2 %480 }
 0x1b0   : > { %513 = vst.msk [vmem:[#allocation2 + $0x4] sm:$0x1] %vm427_vm4, %v499_v32  ;;  %v439_v34 = vpop.permute.xlu1 %438  ;;  %v660_v32 = vld [vmem:[%s1237_s17 + $0x8] sm:$0xff] }
 0x1b1   : > { %453 = vst.msk [vmem:[#allocation2 + $0x1] sm:$0x1] %vm427_vm4, %v439_v34  ;;  %v896_v34 = vld [vmem:[%s1237_s17 + $0x18] sm:$0xff] }
 0x1b2   : > { %494 = vst.msk [vmem:[#allocation2 + $0xb] sm:$0x1] %vm427_vm4, %v481_v33 }
 0x1b7   : > { %v559_v36 = vpop.permute.xlu0 %558  ;;  %v541_v37 = vpop.permute.xlu2 %540 }
 0x1b8   : > { %573 = vst.msk [vmem:[#allocation2 + $0x7] sm:$0x1] %vm427_vm4, %v559_v36  ;;  %v479_v38 = vpop.permute.xlu1 %478 }
 0x1b9   : > { %493 = vst.msk [vmem:[#allocation2 + $0x3] sm:$0x1] %vm427_vm4, %v479_v38  ;;  %v900_v38 = vld [vmem:[%s1237_s17 + $0x20] sm:$0xff] }
 0x1ba   : > { %554 = vst.msk [vmem:[#allocation2 + $0xe] sm:$0x1] %vm427_vm4, %v541_v37 }
 0x1bf   : > { %v461_v39 = vpop.permute.xlu0 %460  ;;  %v443_v40 = vpop.permute.xlu2 %442 }
 0x1c0   : > { %v539_v41 = vpop.permute.xlu1 %538  ;;  %474 = vst.msk [vmem:[#allocation2 + $0xa] sm:$0x1] %vm427_vm4, %v461_v39 }
 0x1c1   : > { %553 = vst.msk [vmem:[#allocation2 + $0x6] sm:$0x1] %vm427_vm4, %v539_v41  ;;  %v901_v41 = vld [vmem:[%s1237_s17 + $0x28] sm:$0xff] }
 0x1c2   : > { %455 = vst.msk [vmem:[#allocation2 + $0x11] sm:$0x1] %vm427_vm4, %v443_v40 }
 0x1c7   : > { %v521_v42 = vpop.permute.xlu0 %520  ;;  %v465_v43 = vpop.permute.xlu2 %464 }
 0x1c8   : > { %v501_v44 = vpop.permute.xlu1 %500  ;;  %534 = vst.msk [vmem:[#allocation2 + $0xd] sm:$0x1] %vm427_vm4, %v521_v42  ;;  %v578_v51 = vld [vmem:[#allocation2] sm:$0xff] }
 0x1c9   : > { %514 = vst.msk [vmem:[#allocation2 + $0xc] sm:$0x1] %vm427_vm4, %v501_v44  ;;  %v905_v44 = vld [vmem:[%s1237_s17 + $0x30] sm:$0xff] }
 0x1ca   : > { %476 = vst.msk [vmem:[#allocation2 + $0x1a] sm:$0x1] %vm427_vm4, %v465_v43 }
 0x1cf   : > { %v445_v45 = vpop.permute.xlu0 %444  ;;  %v503_v46 = vpop.permute.xlu2 %502 }
 0x1d0   : > { %v561_v47 = vpop.permute.xlu1 %560  ;;  %456 = vst.msk [vmem:[#allocation2 + $0x19] sm:$0x1] %vm427_vm4, %v445_v45 }
 0x1d1   : > { %574 = vst.msk [vmem:[#allocation2 + $0xf] sm:$0x1] %vm427_vm4, %v561_v47  ;;  %v906_v47 = vld [vmem:[%s1237_s17 + $0x38] sm:$0xff] }
 0x1d2   : > { %515 = vst.msk [vmem:[#allocation2 + $0x14] sm:$0x1] %vm427_vm4, %v503_v46 }
 0x1d7   : > { %v483_v48 = vpop.permute.xlu0 %482  ;;  %v525_v49 = vpop.permute.xlu2 %524 }
 0x1d8   : > { %v463_v50 = vpop.permute.xlu1 %462  ;;  %495 = vst.msk [vmem:[#allocation2 + $0x13] sm:$0x1] %vm427_vm4, %v483_v48  ;;  %v579_v52 = vld [vmem:[#allocation2 + $0x8] sm:$0xff] }
 0x1d9   : > { %475 = vst.msk [vmem:[#allocation2 + $0x12] sm:$0x1] %vm427_vm4, %v463_v50  ;;  %v583_v53 = vpack.c.bf16 %v579_v52, %v578_v51  ;;  %v910_v48 = vld [vmem:[%s1237_s17 + $0x40] sm:$0xff] }
 0x1da   : > { %536 = vst.msk [vmem:[#allocation2 + $0x1d] sm:$0x1] %vm427_vm4, %v525_v49 }
 0x1db   : > { %886 = vmatmul.msk.bf16.vlgmr.msra.gmra.mxu2 %vm394_vm3, %v583_v53  ;;  %v911_v53 = vld [vmem:[%s1237_s17 + $0x48] sm:$0xff] }
 0x1df   : > { %v505_v54 = vpop.permute.xlu0 %504  ;;  %v563_v55 = vpop.permute.xlu2 %562 }
 0x1e0   : > { %v485_v56 = vpop.permute.xlu1 %484  ;;  %516 = vst.msk [vmem:[#allocation2 + $0x1c] sm:$0x1] %vm427_vm4, %v505_v54 }
 0x1e1   : > { %496 = vst.msk [vmem:[#allocation2 + $0x1b] sm:$0x1] %vm427_vm4, %v485_v56 }
 0x1e2   : > { %575 = vst.msk [vmem:[#allocation2 + $0x17] sm:$0x1] %vm427_vm4, %v563_v55 }
 0x1e7   : > { %v543_v57 = vpop.permute.xlu0 %542  ;;  %v467_v58 = vpop.permute.xlu2 %466 }
 0x1e8   : > { %v523_v59 = vpop.permute.xlu1 %522  ;;  %555 = vst.msk [vmem:[#allocation2 + $0x16] sm:$0x1] %vm427_vm4, %v543_v57 }
 0x1e9   : > { %535 = vst.msk [vmem:[#allocation2 + $0x15] sm:$0x1] %vm427_vm4, %v523_v59 }
 0x1ea   : > { %477 = vst.msk [vmem:[#allocation2 + $0x22] sm:$0x1] %vm427_vm4, %v467_v58 }
 0x1ef   : > { %v565_v60 = vpop.permute.xlu0 %564  ;;  %v527_v61 = vpop.permute.xlu2 %526 }
 0x1f0   : > { %v545_v62 = vpop.permute.xlu1 %544  ;;  %576 = vst.msk [vmem:[#allocation2 + $0x1f] sm:$0x1] %vm427_vm4, %v565_v60  ;;  %v580_v1 = vld [vmem:[#allocation2 + $0x10] sm:$0xff] }
 0x1f1   : > { %556 = vst.msk [vmem:[#allocation2 + $0x1e] sm:$0x1] %vm427_vm4, %v545_v62 }
 0x1f2   : > { %537 = vst.msk [vmem:[#allocation2 + $0x25] sm:$0x1] %vm427_vm4, %v527_v61 }
 0x1f7   : > { %v487_v63 = vpop.permute.xlu0 %486 }
 0x1f8   : > { %v447_v0 = vpop.permute.xlu1 %446  ;;  %497 = vst.msk [vmem:[#allocation2 + $0x23] sm:$0x1] %vm427_vm4, %v487_v63  ;;  %v581_v2 = vld [vmem:[#allocation2 + $0x18] sm:$0xff] }
 0x1f9   : > { %457 = vst.msk [vmem:[#allocation2 + $0x21] sm:$0x1] %vm427_vm4, %v447_v0  ;;  %v584_v3 = vpack.c.bf16 %v581_v2, %v580_v1 }
 0x1fb   : > { %887 = vmatmul.msk.bf16.gmra.mxu2 %vm394_vm3, %v584_v3 }
 0x1ff   : > { %v547_v4 = vpop.permute.xlu0 %546 }
 0x200   : > { %v507_v5 = vpop.permute.xlu1 %506  ;;  %557 = vst.msk [vmem:[#allocation2 + $0x26] sm:$0x1] %vm427_vm4, %v547_v4 }
 0x201   : > { %517 = vst.msk [vmem:[#allocation2 + $0x24] sm:$0x1] %vm427_vm4, %v507_v5 }
 0x208   : > { %v567_v6 = vpop.permute.xlu1 %566 }
 0x209   : > { %577 = vst.msk [vmem:[#allocation2 + $0x27] sm:$0x1] %vm427_vm4, %v567_v6 }
 0x210   : > { %v582_v7 = vld [vmem:[#allocation2 + $0x20] sm:$0xff] }
 0x211   : > { %v585_v8 = vpack.c.bf16 %v582_v7, %v582_v7 }
 0x213   : > { %888 = vmatmul.msk.bf16.gmra.mxu2 %vm394_vm3, %v585_v8 }
 0x25e   : > { %v612_v9 = vpop.f32.mrf.mxu2 }
 0x25f   : > { %v626_v10 = vpack.c.bf16 %v612_v9, %v612_v9 }
 0x261   : > { %v643_v11 = vsel %vm358_vm1, %v626_v10, 0 }
 0x262   : > { %652 = vmatpush.bf16.msra.mxu3 %v643_v11 }
 0x265   : > { %893 = vmatmul.msk.bf16.vlgmr.msra.gmra.mxu3 %vm638_vm5, %v919_v12 }
 0x266   : > { %v614_v13 = vpop.f32.mrf.mxu2 }
 0x267   : > { %v627_v14 = vpack.c.bf16 %v614_v13, %v614_v13 }
 0x269   : > { %v666_v15 = vsel %vm358_vm1, %v627_v14, 0 }
 0x26a   : > { %675 = vmatpush.bf16.msrb.mxu1 %v666_v15 }
 0x26d   : > { %894 = vmatmul.msk.bf16.vlgmr.msrb.gmra.mxu1 %vm638_vm5, %v919_v12 }
 0x27e   : > { %v617_v16 = vpop.f32.mrf.mxu2 }
 0x27f   : > { %v628_v17 = vpack.c.bf16 %v617_v16, %v617_v16 }
 0x281   : > { %v690_v18 = vsel %vm358_vm1, %v628_v17, 0 }
 0x282   : > { %699 = vmatpush.bf16.msrb.mxu0 %v690_v18 }
 0x285   : > { %899 = vmatmul.msk.bf16.vlgmr.msrb.gmra.mxu0 %vm638_vm5, %v919_v12 }
 0x286   : > { %v619_v19 = vpop.f32.mrf.mxu2 }
 0x287   : > { %v629_v20 = vpack.c.bf16 %v619_v19, %v619_v19 }
 0x289   : > { %v714_v21 = vsel %vm358_vm1, %v629_v20, 0 }
 0x28a   : > { %723 = vmatpush.bf16.msrb.mxu3 %v714_v21 }
 0x28d   : > { %904 = vmatmul.msk.bf16.vlgmr.msrb.gmra.mxu3 %vm638_vm5, %v919_v12 }
 0x296   : > { %v622_v22 = vpop.f32.mrf.mxu2 }
 0x297   : > { %v630_v23 = vpack.c.bf16 %v622_v22, %v622_v22 }
 0x299   : > { %v738_v24 = vsel %vm358_vm1, %v630_v23, 0 }
 0x29a   : > { %747 = vmatpush.bf16.msra.mxu1 %v738_v24 }
 0x29d   : > { %909 = vmatmul.msk.bf16.vlgmr.msra.gmra.mxu1 %vm638_vm5, %v919_v12 }
 0x29e   : > { %v624_v25 = vpop.f32.mrf.mxu2 }
 0x2e8   : > { %v654_v27 = vpop.f32.mrf.mxu3 }
 0x2e9   : > { %v661_v29 = vadd.f32 %v659_v26, %v654_v27 }
 0x2ea   : > { %v677_v30 = vpop.f32.mrf.mxu1 }
 0x2eb   : > { %663 = vst.msk [vmem:[%s1237_s17] sm:$0xff] %vm394_vm3, %v661_v29  ;;  %v685_v31 = vadd.f32 %v895_v28, %v677_v30 }
 0x2ed   : > { %897 = vst.msk [vmem:[%s1237_s17 + $0x10] sm:$0xff] %vm394_vm3, %v685_v31 }
 0x2f0   : > { %v656_v33 = vpop.f32.mrf.mxu3 }
 0x2f1   : > { %v662_v35 = vadd.f32 %v660_v32, %v656_v33 }
 0x2f2   : > { %v679_v36 = vpop.f32.mrf.mxu1 }
 0x2f3   : > { %664 = vst.msk [vmem:[%s1237_s17 + $0x8] sm:$0xff] %vm394_vm3, %v662_v35  ;;  %v686_v37 = vadd.f32 %v896_v34, %v679_v36 }
 0x2f5   : > { %898 = vst.msk [vmem:[%s1237_s17 + $0x18] sm:$0xff] %vm394_vm3, %v686_v37 }
 0x302   : > { %v701_v39 = vpop.f32.mrf.mxu0 }
 0x303   : > { %v709_v40 = vadd.f32 %v900_v38, %v701_v39 }
 0x305   : > { %902 = vst.msk [vmem:[%s1237_s17 + $0x20] sm:$0xff] %vm394_vm3, %v709_v40 }
 0x30a   : > { %v703_v42 = vpop.f32.mrf.mxu0 }
 0x30b   : > { %v710_v43 = vadd.f32 %v901_v41, %v703_v42 }
 0x30d   : > { %903 = vst.msk [vmem:[%s1237_s17 + $0x28] sm:$0xff] %vm394_vm3, %v710_v43 }
 0x310   : > { %v725_v45 = vpop.f32.mrf.mxu3 }
 0x311   : > { %v733_v46 = vadd.f32 %v905_v44, %v725_v45 }
 0x313   : > { %907 = vst.msk [vmem:[%s1237_s17 + $0x30] sm:$0xff] %vm394_vm3, %v733_v46 }
 0x318   : > { %v727_v49 = vpop.f32.mrf.mxu3 }
 0x319   : > { %v734_v50 = vadd.f32 %v906_v47, %v727_v49 }
 0x31a   : > { %v749_v51 = vpop.f32.mrf.mxu1 }
 0x31b   : > { %v757_v52 = vadd.f32 %v910_v48, %v749_v51  ;;  %908 = vst.msk [vmem:[%s1237_s17 + $0x38] sm:$0xff] %vm394_vm3, %v734_v50 }
 0x31d   : > { %912 = vst.msk [vmem:[%s1237_s17 + $0x40] sm:$0xff] %vm394_vm3, %v757_v52 }
 0x322   : > { %v751_v54 = vpop.f32.mrf.mxu1 }
 0x323   : > { %v758_v55 = vadd.f32 %v911_v53, %v751_v54 }
 0x325   : > { %913 = vst.msk [vmem:[%s1237_s17 + $0x48] sm:$0xff] %vm394_vm3, %v758_v55 }
 0x326   : > { %1033 = shalt.err (!%p1030_p8)
}
 0x327   : > { %s1111_s17 = smov 128   ;;  %s1112_s18 = smov 8  }
 0x328   : > { %922 = dma.vmem_to_hbm [thread:$0]  (%p1202_p3), %s775_s15, 1280, %s777_s16, %s762_s28, %s1111_s17, %s1111_s17, %s1112_s18  }
 0x329 PF: > { %p928_p10 = scmp.ge.s32.totalorder %s1100_s8, 2  ;;  %s791_s22 = sand.u32 1, %s1072_s24  }
 0x32a   : > { %s792_s12 = scalar_lea.sflag [#allocation4], %s791_s22 }
 0x32b   : > { %p925_p11 = pnand %p928_p10, %p1212_p9 }
 0x32d   : > { %p926_p12 = pneg %p925_p11 }
 0x32f   : > { %1067 = dma.done.wait (%p926_p12), %s792_s12, 1280  }
 0x330   : > { %1069 = vsyncadd (%p926_p12), %s792_s12, 4294966016  ;;  %s20_s8 = sadd.s32 1, %s1100_s8   ;;  %s1445_s23 = sld [smem:[#allocation10_spill]] }
 0x331   : > { %p17_p13 = scmp.ge.s32.totalorder %s20_s8, 6   ;;  %s1446_s27 = sld [smem:[#allocation6_spill]] }
 0x332   : > { %s1447_s28 = sld [smem:[#allocation7_spill]]  ;;  %s1450_s24 = smov %s1076_s25 }
 0x333   : > { %s1448_s29 = sld [smem:[#allocation8_spill]]  ;;  %s1451_s25 = smov %s1080_s26 }
 0x334   : > { %s1449_s30 = sld [smem:[#allocation9_spill]]  ;;  %19 = sbr.rel (!%p17_p13) target bundleno = 5 (0x5), region = 94 }
 0x336   : > { %s1452_s26 = smov %s1445_s23 }
 0x339   :  { %798 = vsyncpa [#allocation4], 1 }
 0x33a   :  { %800 = vsyncpa [#allocation4 + $0x1], 1 }

</bundles_post_ra>
